<compile_context>
chip_gen: v7x
topology: tpu7x:2x2x1
jax: 0.10.0
libtpu: 0.0.40
codegen_flags: <defaults>
</compile_context>

<pallas_src>
import numpy as np

import jax
import jax.numpy as jnp
from jax.experimental import pallas as pl
from jax.experimental.pallas import tpu as pltpu


def _pick_block_batch(batch, n_agents, target_rows=256):
    """Pick BB (batch elements per grid step) so BB*N ~ target_rows and BB | batch."""
    if batch * n_agents <= target_rows or batch % 8 != 0:
        return batch                       # single grid step covers everything
    bb = min(batch, max(8, ((target_rows // n_agents) // 8) * 8))
    while batch % bb != 0:
        bb -= 8
    return max(bb, 8)


def macom_forward(x, w_enc, b_enc, w_dec, b_dec, *, target_rows=256):
    B, N, D = x.shape
    H = w_enc.shape[1]
    M = w_dec.shape[1]

    BB = _pick_block_batch(B, N, target_rows)
    R = BB * N                             # packed rows per grid step
    grid = (B // BB,)

    # Fold batch into rows outside the kernel (free, contiguous reshape) and cast
    # MXU operands to bf16 (halves DMA bytes; accumulation stays f32 in-kernel).
    x2d = x.reshape(B * N, D).astype(jnp.bfloat16)
    we = w_enc.astype(jnp.bfloat16)
    wd = w_dec.astype(jnp.bfloat16)
    be = b_enc.astype(jnp.float32)
    bd = b_dec.astype(jnp.float32)

    # Additive block-diagonal attention bias: 0 within a batch element, -1e30 across
    # batch elements. Identical for every grid step (constant index_map).
    blk = np.repeat(np.arange(BB), N)
    attn_bias = jnp.asarray(
        np.where(blk[:, None] == blk[None, :], 0.0, -1e30), dtype=jnp.float32)

    def kernel(x_ref, we_ref, be_ref, wd_ref, bd_ref, bias_ref, o_ref):
        xb = x_ref[...]                                             # [R, D] bf16

        # ---- encoding net: Linear(D -> H), packed over BB batch elements ----
        enc = jnp.dot(xb, we_ref[...],
                      preferred_element_type=jnp.float32) + be_ref[...]   # [R, H] f32
        enc_b = enc.astype(jnp.bfloat16)

        # ---- attention scores: packed enc @ enc^T with block-diagonal masking ----
        s = jax.lax.dot_general(
            enc_b, enc_b, (((1,), (1,)), ((), ())),
            preferred_element_type=jnp.float32)                     # [R, R] f32
        s = s + bias_ref[...]                                       # mask BEFORE softmax

        # ---- softmax over torch dim=1 == axis 0 of each per-batch [N, N] block ----
        s = s - jnp.max(s, axis=0, keepdims=True)
        e = jnp.exp(s)
        w = e * pl.reciprocal(jnp.sum(e, axis=0, keepdims=True), approx=True)

        # ---- pre_output = w @ enc (block-diagonal w => no cross-batch mixing) ----
        pre = jnp.dot(w.astype(jnp.bfloat16), enc_b,
                      preferred_element_type=jnp.float32)           # [R, H] f32

        # ---- decoding net: Linear(H -> M) ----
        out = jnp.dot(pre.astype(jnp.bfloat16), wd_ref[...],
                      preferred_element_type=jnp.float32) + bd_ref[...]   # [R, M] f32

        # ---- reduce='max' over agents (torch dim=1) ----
        if N % 8 == 0:
            o_ref[...] = jnp.max(out.reshape(BB, N, M), axis=1)     # [BB, M]
        else:
            for bb in range(BB):                                    # unrolled at trace time
                o_ref[bb, :] = jnp.max(out[bb * N:(bb + 1) * N, :], axis=0)

    return pl.pallas_call(
        kernel,
        out_shape=jax.ShapeDtypeStruct((B, M), jnp.float32),
        grid_spec=pltpu.PrefetchScalarGridSpec(
            num_scalar_prefetch=0,
            grid=grid,
            in_specs=[
                pl.BlockSpec((R, D), lambda b: (b, 0)),     # packed x rows
                pl.BlockSpec((D, H), lambda b: (0, 0)),     # enc weight (constant)
                pl.BlockSpec((1, H), lambda b: (0, 0)),     # enc bias
                pl.BlockSpec((H, M), lambda b: (0, 0)),     # dec weight (constant)
                pl.BlockSpec((1, M), lambda b: (0, 0)),     # dec bias
                pl.BlockSpec((R, R), lambda b: (0, 0)),     # block-diagonal bias
            ],
            out_specs=pl.BlockSpec((BB, M), lambda b: (b, 0)),
        ),
        compiler_params=pltpu.CompilerParams(
            dimension_semantics=("parallel",)),
    )(x2d, we, be, wd, bd, attn_bias)


def macom_reference(x, w_enc, b_enc, w_dec, b_dec):
    enc = jnp.einsum("bnd,dh->bnh", x, w_enc) + b_enc              # [B, N, H]
    w = jnp.einsum("bih,bjh->bij", enc, enc)                       # [B, N, N]
    w = jax.nn.softmax(w, axis=1)                                  # torch dim=1
    pre = jnp.einsum("bij,bjh->bih", w, enc)                       # [B, N, H]
    out = jnp.einsum("bnh,hm->bnm", pre, w_dec) + b_dec            # [B, N, M]
    return jnp.max(out, axis=1)                                    # [B, M]


if __name__ == "__main__":
    B, N, D, H, M = 2, 8, 32, 32, 32   # batch, n_agents, latent_msg_dim, hidden, msg_dim

    key = jax.random.PRNGKey(0)
    kx, ke, kbe, kd, kbd = jax.random.split(key, 5)

    x = jax.random.normal(kx, (B, N, D), dtype=jnp.float32)
    w_enc = jax.random.normal(ke, (D, H), dtype=jnp.float32) * 0.1
    b_enc = jax.random.normal(kbe, (1, H), dtype=jnp.float32) * 0.1
    w_dec = jax.random.normal(kd, (H, M), dtype=jnp.float32) * 0.1
    b_dec = jax.random.normal(kbd, (1, M), dtype=jnp.float32) * 0.1

    out = macom_forward(x, w_enc, b_enc, w_dec, b_dec)
    out = jax.block_until_ready(out)

    ref = macom_reference(x, w_enc, b_enc, w_dec, b_dec)
    assert out.shape == (B, M)
    # bf16 MXU operands (f32 accumulation) vs. an f32 reference -> slightly looser
    # tolerance than a pure-f32 kernel would need.
    assert jnp.allclose(out, ref, atol=3e-2, rtol=3e-2), "mismatch vs reference"

    print("KERNEL_OK")
</pallas_src>

<mosaic_0001>
module attributes {stable_mosaic.version = 11 : i64} {
  func.func @kernel(%arg0: i32, %arg1: memref<16x32xbf16, #tpu.memory_space<vmem>>, %arg2: memref<32x32xbf16, #tpu.memory_space<vmem>>, %arg3: memref<1x32xf32, #tpu.memory_space<vmem>>, %arg4: memref<32x32xbf16, #tpu.memory_space<vmem>>, %arg5: memref<1x32xf32, #tpu.memory_space<vmem>>, %arg6: memref<16x16xf32, #tpu.memory_space<vmem>>, %arg7: memref<2x32xf32, #tpu.memory_space<vmem>>) attributes {dimension_semantics = [#tpu.dimension_semantics<parallel>], iteration_bounds = array<i64: 1>, scalar_prefetch = 0 : i64, scratch_operands = 0 : i64, tpu.core_type = #tpu.core_type<tc>, window_params = [{transform_indices = @transform_0, window_bounds = array<i64: 16, 32>}, {pipeline_mode = #tpu.pipeline_mode<synchronous>, transform_indices = @transform_1, window_bounds = array<i64: 32, 32>}, {pipeline_mode = #tpu.pipeline_mode<synchronous>, transform_indices = @transform_2, window_bounds = array<i64: 1, 32>}, {pipeline_mode = #tpu.pipeline_mode<synchronous>, transform_indices = @transform_3, window_bounds = array<i64: 32, 32>}, {pipeline_mode = #tpu.pipeline_mode<synchronous>, transform_indices = @transform_4, window_bounds = array<i64: 1, 32>}, {pipeline_mode = #tpu.pipeline_mode<synchronous>, transform_indices = @transform_5, window_bounds = array<i64: 16, 16>}, {transform_indices = @transform_6, window_bounds = array<i64: 2, 32>}]} {
    %c0 = arith.constant 0 : index
    %c0_0 = arith.constant 0 : index
    %0 = vector.load %arg1[%c0, %c0_0] : memref<16x32xbf16, #tpu.memory_space<vmem>>, vector<16x32xbf16>
    %c0_1 = arith.constant 0 : index
    %c0_2 = arith.constant 0 : index
    %1 = vector.load %arg2[%c0_1, %c0_2] : memref<32x32xbf16, #tpu.memory_space<vmem>>, vector<32x32xbf16>
    %cst = arith.constant dense<0.000000e+00> : vector<16x32xf32>
    %2 = tpu.matmul %0, %1, %cst {dimension_numbers = #tpu.dot_dimension_numbers<[1], [0], [0], [1], [0, 0, 1, 1], [], []>} : vector<16x32xbf16>, vector<32x32xbf16>, vector<16x32xf32> -> vector<16x32xf32>
    %c0_3 = arith.constant 0 : index
    %c0_4 = arith.constant 0 : index
    %3 = vector.load %arg3[%c0_3, %c0_4] : memref<1x32xf32, #tpu.memory_space<vmem>>, vector<1x32xf32>
    %4 = vector.broadcast %3 : vector<1x32xf32> to vector<16x32xf32>
    %5 = arith.addf %2, %4 : vector<16x32xf32>
    %6 = arith.truncf %5 : vector<16x32xf32> to vector<16x32xbf16>
    %cst_5 = arith.constant dense<0.000000e+00> : vector<16x16xf32>
    %7 = tpu.matmul %6, %6, %cst_5 {dimension_numbers = #tpu.dot_dimension_numbers<[1], [1], [0], [0], [0, 0, 1, 0], [], []>} : vector<16x32xbf16>, vector<16x32xbf16>, vector<16x16xf32> -> vector<16x16xf32>
    %c0_6 = arith.constant 0 : index
    %c0_7 = arith.constant 0 : index
    %8 = vector.load %arg6[%c0_6, %c0_7] : memref<16x16xf32, #tpu.memory_space<vmem>>, vector<16x16xf32>
    %9 = arith.addf %7, %8 : vector<16x16xf32>
    %cst_8 = arith.constant dense<0xFF800000> : vector<16xf32>
    %10 = vector.multi_reduction <maximumf>, %9, %cst_8 [0] : vector<16x16xf32> to vector<16xf32>
    %11 = vector.shape_cast %10 : vector<16xf32> to vector<1x16xf32>
    %12 = vector.broadcast %11 : vector<1x16xf32> to vector<16x16xf32>
    %13 = arith.subf %9, %12 : vector<16x16xf32>
    %14 = math.exp %13 : vector<16x16xf32>
    %cst_9 = arith.constant dense<0.000000e+00> : vector<16xf32>
    %15 = vector.multi_reduction <add>, %14, %cst_9 [0] : vector<16x16xf32> to vector<16xf32>
    %16 = vector.shape_cast %15 : vector<16xf32> to vector<1x16xf32>
    %17 = tpu.reciprocal %16 {approx = true} : vector<1x16xf32> -> vector<1x16xf32>
    %18 = vector.broadcast %17 : vector<1x16xf32> to vector<16x16xf32>
    %19 = arith.mulf %14, %18 : vector<16x16xf32>
    %20 = arith.truncf %19 : vector<16x16xf32> to vector<16x16xbf16>
    %cst_10 = arith.constant dense<0.000000e+00> : vector<16x32xf32>
    %21 = tpu.matmul %20, %6, %cst_10 {dimension_numbers = #tpu.dot_dimension_numbers<[1], [0], [0], [1], [0, 0, 1, 1], [], []>} : vector<16x16xbf16>, vector<16x32xbf16>, vector<16x32xf32> -> vector<16x32xf32>
    %22 = arith.truncf %21 : vector<16x32xf32> to vector<16x32xbf16>
    %c0_11 = arith.constant 0 : index
    %c0_12 = arith.constant 0 : index
    %23 = vector.load %arg4[%c0_11, %c0_12] : memref<32x32xbf16, #tpu.memory_space<vmem>>, vector<32x32xbf16>
    %cst_13 = arith.constant dense<0.000000e+00> : vector<16x32xf32>
    %24 = tpu.matmul %22, %23, %cst_13 {dimension_numbers = #tpu.dot_dimension_numbers<[1], [0], [0], [1], [0, 0, 1, 1], [], []>} : vector<16x32xbf16>, vector<32x32xbf16>, vector<16x32xf32> -> vector<16x32xf32>
    %c0_14 = arith.constant 0 : index
    %c0_15 = arith.constant 0 : index
    %25 = vector.load %arg5[%c0_14, %c0_15] : memref<1x32xf32, #tpu.memory_space<vmem>>, vector<1x32xf32>
    %26 = vector.broadcast %25 : vector<1x32xf32> to vector<16x32xf32>
    %27 = arith.addf %24, %26 : vector<16x32xf32>
    %28 = vector.shape_cast %27 : vector<16x32xf32> to vector<2x8x32xf32>
    %cst_16 = arith.constant dense<0xFF800000> : vector<2x32xf32>
    %29 = vector.multi_reduction <maximumf>, %28, %cst_16 [1] : vector<2x8x32xf32> to vector<2x32xf32>
    %c0_17 = arith.constant 0 : index
    %c0_18 = arith.constant 0 : index
    %30 = vector.load %arg7[%c0_17, %c0_18] : memref<2x32xf32, #tpu.memory_space<vmem>>, vector<2x32xf32>
    tpu.vector_store %arg7[%c0_17, %c0_18], %29 {strides = array<i32>} : memref<2x32xf32, #tpu.memory_space<vmem>>, vector<2x32xf32>,
    return
  }
  func.func @transform_0(%arg0: i32) -> (i32, i32) {
    %c0_i32 = arith.constant 0 : i32
    %c0_i32_0 = arith.constant 0 : i32
    return %arg0, %c0_i32 : i32, i32
  }
  func.func @transform_1(%arg0: i32) -> (i32, i32) {
    %c0_i32 = arith.constant 0 : i32
    %c0_i32_0 = arith.constant 0 : i32
    %c0_i32_1 = arith.constant 0 : i32
    return %c0_i32, %c0_i32_0 : i32, i32
  }
  func.func @transform_2(%arg0: i32) -> (i32, i32) {
    %c0_i32 = arith.constant 0 : i32
    %c0_i32_0 = arith.constant 0 : i32
    %c0_i32_1 = arith.constant 0 : i32
    return %c0_i32, %c0_i32_0 : i32, i32
  }
  func.func @transform_3(%arg0: i32) -> (i32, i32) {
    %c0_i32 = arith.constant 0 : i32
    %c0_i32_0 = arith.constant 0 : i32
    %c0_i32_1 = arith.constant 0 : i32
    return %c0_i32, %c0_i32_0 : i32, i32
  }
  func.func @transform_4(%arg0: i32) -> (i32, i32) {
    %c0_i32 = arith.constant 0 : i32
    %c0_i32_0 = arith.constant 0 : i32
    %c0_i32_1 = arith.constant 0 : i32
    return %c0_i32, %c0_i32_0 : i32, i32
  }
  func.func @transform_5(%arg0: i32) -> (i32, i32) {
    %c0_i32 = arith.constant 0 : i32
    %c0_i32_0 = arith.constant 0 : i32
    %c0_i32_1 = arith.constant 0 : i32
    return %c0_i32, %c0_i32_0 : i32, i32
  }
  func.func @transform_6(%arg0: i32) -> (i32, i32) {
    %c0_i32 = arith.constant 0 : i32
    %c0_i32_0 = arith.constant 0 : i32
    return %arg0, %c0_i32 : i32, i32
  }
}

</mosaic_0001>

<bundles_post_ra>
// kernel: tpu_custom_call.1
= control target key start
LH: loop header
LB: loop body
LE: loop exit
PB: predicated region body
PF: predicated region fallthrough
CT: control target
= control target key end

     0   :  { %11 = vsyncpa [#allocation3], 0  ;;  %s662_s0 = inlined_call_operand.hbm [shape: bf16[16,32], index: 0, kind: input, shape index: {}]   ;;  %s663_s1 = inlined_call_operand.hbm [shape: bf16[32,32], index: 1, kind: input, shape index: {}]   ;;  %s664_s2 = inlined_call_operand.vmem [shape: f32[1,32], index: 2, kind: input, shape index: {}]   ;;  %s665_s3 = inlined_call_operand.hbm [shape: bf16[32,32], index: 3, kind: input, shape index: {}]   ;;  %s666_s4 = inlined_call_operand.vmem [shape: f32[1,32], index: 4, kind: input, shape index: {}]   ;;  %s667_s5 = inlined_call_operand.vmem [shape: f32[16,16], index: 5, kind: input, shape index: {}]   ;;  %s668_s6 = inlined_call_operand.hbm [shape: f32[2,32], index: 6, kind: output, shape index: {}]  }
   0x1   :  { %12 = vsyncpa [#allocation6], 0 }
   0x2   :  { %13 = vsyncpa [#allocation4], 0  ;;  %s528_s21 = smov [#allocation5]   ;;  %s529_s23 = smov [#allocation2]  }
   0x3   :  { %s31_s22 = sshll.u32 %s528_s21, 4  ;;  %s19_s24 = sshll.u32 %s529_s23, 4  ;;  %s32_s22 = int_to_ptr.vmem [resolvable:$true] %s31_s22  ;;  %s571_s24 = int_to_ptr.vmem [resolvable:$true] %s19_s24 }
   0x4   :  { %s434_s27 = scalar_lea.hbm %s663_s1, 256 }
   0x5   :  { %p435_p0 = scmp.ne.s32.totalorder %s663_s1, %s434_s27  ;;  %p438_p1 = scmp.lt.u32.totalorder %s434_s27, %s663_s1 }
   0x7   :  { %p440_p2 = pnand %p438_p1, %p435_p0 }
   0x9   :  { %443 = shalt.err (!%p440_p2)
}
   0xa   :  { %s444_s8 = scalar_lea.vmem %s32_s22, 256  ;;  %p449_p4 = scmp.lt.s32.totalorder %s32_s22, %s32_s22 }
   0xb   :  { %p445_p3 = scmp.ne.s32.totalorder %s32_s22, %s444_s8  ;;  %p450_p5 = scmp.lt.s32.totalorder %s444_s8, %s444_s8 }
   0xd   :  { %p451_p6 = por %p450_p5, %p449_p4 }
   0xf   :  { %p452_p7 = pnand %p451_p6, %p445_p3 }
  0x11   :  { %455 = shalt.err (!%p452_p7)
}
  0x12   :  { %s530_s9 = smov 64   ;;  %s531_s10 = smov 4  }
  0x13   :  { %37 = dma.hbm_to_vmem [thread:$0]  %s663_s1, 256, %s32_s22, [#allocation6], %s530_s9, %s530_s9, %s531_s10  }
  0x14   :  { %s456_s15 = scalar_lea.hbm %s662_s0, 128 }
  0x15   :  { %p457_p8 = scmp.ne.s32.totalorder %s662_s0, %s456_s15  ;;  %p460_p9 = scmp.lt.u32.totalorder %s456_s15, %s662_s0 }
  0x17   :  { %p462_p10 = pnand %p460_p9, %p457_p8 }
  0x19   :  { %465 = shalt.err (!%p462_p10)
}
  0x1a   :  { %s466_s20 = scalar_lea.vmem %s571_s24, 128  ;;  %p471_p12 = scmp.lt.s32.totalorder %s571_s24, %s571_s24 }
  0x1b   :  { %p467_p11 = scmp.ne.s32.totalorder %s571_s24, %s466_s20  ;;  %p472_p13 = scmp.lt.s32.totalorder %s466_s20, %s466_s20 }
  0x1d   :  { %p473_p0 = por %p472_p13, %p471_p12 }
  0x1f   :  { %p474_p1 = pnand %p473_p0, %p467_p11 }
  0x21   :  { %477 = shalt.err (!%p474_p1)
}
  0x22   :  { %25 = dma.hbm_to_vmem [thread:$0]  %s662_s0, 128, %s571_s24, [#allocation3], %s530_s9, %s530_s9, %s531_s10  }
  0x23   :  { %s532_s22 = smov [#allocation7]   ;;  %s478_s27 = scalar_lea.hbm %s665_s3, 256 }
  0x24   :  { %s45_s23 = sshll.u32 %s532_s22, 4  ;;  %p479_p2 = scmp.ne.s32.totalorder %s665_s3, %s478_s27  ;;  %s46_s23 = int_to_ptr.vmem [resolvable:$true] %s45_s23 }
  0x25   :  { %p482_p3 = scmp.lt.u32.totalorder %s478_s27, %s665_s3 }
  0x27   :  { %p484_p4 = pnand %p482_p3, %p479_p2 }
  0x29   :  { %487 = shalt.err (!%p484_p4)
}
  0x2a   :  { %s488_s8 = scalar_lea.vmem %s46_s23, 256  ;;  %p493_p6 = scmp.lt.s32.totalorder %s46_s23, %s46_s23 }
  0x2b   :  { %p489_p5 = scmp.ne.s32.totalorder %s46_s23, %s488_s8  ;;  %p494_p7 = scmp.lt.s32.totalorder %s488_s8, %s488_s8 }
  0x2d   :  { %p495_p8 = por %p494_p7, %p493_p6 }
  0x2f   :  { %p496_p9 = pnand %p495_p8, %p489_p5 }
  0x31   :  { %499 = shalt.err (!%p496_p9)
}
  0x32   :  { %51 = dma.hbm_to_vmem [thread:$0]  %s665_s3, 256, %s46_s23, [#allocation6], %s530_s9, %s530_s9, %s531_s10  }
  0x33   :  { %522 = dma.done.wait [#allocation3], 128  }
  0x34   :  { %523 = vsyncadd [#allocation3], 4294967168 }
  0x35   :  { %524 = dma.done.wait [#allocation6], 512  }
  0x36   :  { %525 = vsyncadd [#allocation6], 4294966784  ;;  %v533_v0 = vmov 0.0   ;;  %vm534_vm0 = vmmov 0   ;;  %v423_v1 = vld [vmem:[#allocation5] sm:$0xff]   ;;  %v424_v2 = vld [vmem:[#allocation5 + $0x8] sm:$0xff]  }
  0x37   :  { %387 = vmatprep.subr.bf16.mxu0 %v533_v0  ;;  %391 = vmatprep.mubr.msk.bf16.mxu0 %vm534_vm0, %v533_v0  ;;  %v425_v3 = vld [vmem:[#allocation2] sm:$0xff]   ;;  %vm96_vm1 = vcmask 261120   ;;  %v366_v4 = vld [vmem:[%s664_s2] ss:$0 sm:$0xff]  ;;  %v426_v13 = vld [vmem:[#allocation7] sm:$0xff]   ;;  %vm188_vm2 = vcmask 130048  }
  0x38   :  { %395 = vmatprep.subr.bf16.mxu1 %v533_v0  ;;  %397 = vmatprep.mubr.msk.bf16.mxu1 %vm534_vm0, %v533_v0  ;;  %v142_v14 = vld [vmem:[%s667_s5] sm:$0xff]  ;;  %v143_v16 = vld [vmem:[%s667_s5 + $0x8] sm:$0xff]  ;;  %v427_v50 = vld [vmem:[#allocation7 + $0x8] sm:$0xff]   ;;  %vm345_vm3 = vcmask 1041409   ;;  %vm348_vm4 = vcmask 254976  }
  0x39   :  { %388 = vmatpush3.bf16.msra.mxu0 %v423_v1  ;;  %v373_v56 = vld [vmem:[%s666_s4] ss:$0 sm:$0xff]  ;;  %s535_s4 = smov [#allocation8]  }
  0x3a   :  { %389 = vmatprep.subr.bf16.mxu0 %v533_v0  ;;  %s356_s14 = sshll.u32 %s535_s4, 4  ;;  %s357_s14 = int_to_ptr.vmem [resolvable:$true] %s356_s14 }
  0x3b   :  { %s500_s15 = scalar_lea.vmem %s357_s14, 32  ;;  %p505_p11 = scmp.lt.s32.totalorder %s357_s14, %s357_s14 }
  0x3c   :  { %p501_p10 = scmp.ne.s32.totalorder %s357_s14, %s500_s15  ;;  %p506_p12 = scmp.lt.s32.totalorder %s500_s15, %s500_s15 }
  0x3d   :  { %390 = vmatpush3.bf16.msra.mxu0 %v424_v2 }
  0x3e   :  { %401 = vmatprep.subr.bf16.mxu0 %v533_v0  ;;  %p507_p13 = por %p506_p12, %p505_p11 }
  0x40   :  { %392 = vmatmul.mubr.msk.bf16.vlgmr.msra.gmra.mrb[0].mxu0 %vm96_vm1, %v425_v3  ;;  %p508_p0 = pnand %p507_p13, %p501_p10 }
  0x41   :  { %403 = vmatprep.mubr.msk.bf16.mxu0 %vm534_vm0, %v533_v0 }
 0x113   :  { %v134_v5 = vpop.f32.mrb[0].mxu0 }
 0x114   :  { %v393_v6 = vpop.f32.mrb[1].mxu0  ;;  %v135_v8 = vadd.f32 %v366_v4, %v134_v5 }
 0x115   :  { %v137_v7 = vpop.f32.mrb[2].mxu0 }
 0x116   :  { %v138_v9 = vadd.f32 %v366_v4, %v137_v7  ;;  %v394_v10 = vpop.f32.mrb[3].mxu0 }
 0x118   :  { %v141_v11 = vpack.c.bf16 %v138_v9, %v135_v8 }
 0x11a   :  { %402 = vmatpush3.bf16.msra.mxu0 %v141_v11  ;;  %v145_v12 = vsel %vm96_vm1, %v141_v11, 0 }
 0x11b   :  { %396 = vmatpush3.bf16.xpose.msra.mxu1 %v145_v12 }
 0x11c   :  { %407 = vmatprep.subr.bf16.mxu1 %v533_v0 }
 0x122   :  { %398 = vmatmul.mubr.msk.bf16.vlgmr.msra.gmra.mrb[0].mxu1 %vm96_vm1, %v141_v11 }
 0x123   :  { %411 = vmatprep.mubr.msk.bf16.mxu1 %vm534_vm0, %v533_v0  ;;  %408 = vmatpush3.bf16.msra.mxu1 %v426_v13 }
 0x124   :  { %409 = vmatprep.subr.bf16.mxu1 %v533_v0 }
 0x127   :  { %410 = vmatpush3.bf16.msra.mxu1 %v427_v50 }
 0x1f5   :  { %v181_v15 = vpop.f32.mrb[0].mxu1 }
 0x1f6   :  { %v182_v17 = vadd.f32 %v181_v15, %v142_v14  ;;  %v399_v18 = vpop.f32.mrb[1].mxu1 }
 0x1f7   :  { %v184_v19 = vpop.f32.mrb[2].mxu1 }
 0x1f8   :  { %v185_v20 = vadd.f32 %v184_v19, %v143_v16  ;;  %v400_v21 = vpop.f32.mrb[3].mxu1  ;;  %v189_v22 = vsel %vm188_vm2, %v182_v17, -inf }
 0x1fa   :  { %v190_v23 = vsel %vm188_vm2, %v185_v20, -inf }
 0x1fb   :  { %v191_v24 = vmax.f32 %v189_v22, %v190_v23 }
 0x1fd   :  { %v192_v25 = vrot.slane %v191_v24, 4 }
 0x1ff   :  { %v193_v26 = vmax.f32 %v191_v24, %v192_v25 }
 0x201   :  { %v194_v27 = vrot.slane %v193_v26, 2 }
 0x203   :  { %v195_v28 = vmax.f32 %v193_v26, %v194_v27 }
 0x205   :  { %v196_v29 = vrot.slane %v195_v28, 1 }
 0x207   :  { %v197_v30 = vmax.f32 %v195_v28, %v196_v29 }
 0x209   :  { %v198_v31 = vsub.f32 %v182_v17, %v197_v30  ;;  %v199_v32 = vsub.f32 %v185_v20, %v197_v30 }
 0x20b   :  { %v200_v33 = vmul.f32 1.442695, %v198_v31  ;;  %v202_v34 = vmul.f32 1.442695, %v199_v32 }
 0x20d   :  { %428 = vpow2.f32 %v200_v33 }
 0x20e   :  { %430 = vpow2.f32 %v202_v34 }
 0x217   :  { %v429_v35 = vpop.eup %428 }
 0x218   :  { %v431_v36 = vpop.eup %430  ;;  %v204_v37 = vsel %vm188_vm2, %v429_v35, 0.0 }
 0x219   :  { %v205_v38 = vsel %vm188_vm2, %v431_v36, 0.0 }
 0x21a   :  { %v206_v39 = vadd.f32 %v205_v38, %v204_v37 }
 0x21c   :  { %v207_v40 = vrot.slane %v206_v39, 4 }
 0x21e   :  { %v208_v41 = vadd.f32 %v207_v40, %v206_v39 }
 0x220   :  { %v209_v42 = vrot.slane %v208_v41, 2 }
 0x222   :  { %v210_v43 = vadd.f32 %v209_v42, %v208_v41 }
 0x224   :  { %v211_v44 = vrot.slane %v210_v43, 1 }
 0x226   :  { %v212_v45 = vadd.f32 %v211_v44, %v210_v43 }
 0x228   :  { %432 = vrcp.f32 %v212_v45 }
 0x232   :  { %v433_v46 = vpop.eup %432 }
 0x233   :  { %v214_v47 = vmul.f32 %v433_v46, %v429_v35  ;;  %v215_v48 = vmul.f32 %v433_v46, %v431_v36 }
 0x235   :  { %v216_v49 = vpack.c.bf16 %v215_v48, %v214_v47 }
 0x237   :  { %404 = vmatmul.mubr.msk.bf16.vlgmr.msra.gmra.mrb[4].mxu0 %vm188_vm2, %v216_v49 }
 0x30a   :  { %v254_v51 = vpop.f32.mrb[4].mxu0 }
 0x30b   :  { %v405_v52 = vpop.f32.mrb[5].mxu0 }
 0x30c   :  { %v257_v53 = vpop.f32.mrb[6].mxu0 }
 0x30d   :  { %v261_v54 = vpack.c.bf16 %v257_v53, %v254_v51  ;;  %v406_v55 = vpop.f32.mrb[7].mxu0 }
 0x30f   :  { %412 = vmatmul.mubr.msk.bf16.vlgmr.msra.gmra.mrb[4].mxu1 %vm96_vm1, %v261_v54 }
 0x3e2   :  { %v322_v57 = vpop.f32.mrb[4].mxu1 }
 0x3e3   :  { %v323_v58 = vadd.f32 %v373_v56, %v322_v57  ;;  %v413_v59 = vpop.f32.mrb[5].mxu1 }
 0x3e4   :  { %v325_v60 = vpop.f32.mrb[6].mxu1 }
 0x3e5   :  { %v329_v61 = vsel %vm96_vm1, %v323_v58, -inf  ;;  %v326_v62 = vadd.f32 %v373_v56, %v325_v60  ;;  %v414_v63 = vpop.f32.mrb[7].mxu1 }
 0x3e6   :  { %v330_v0 = vrot.slane %v329_v61, 4 }
 0x3e7   :  { %v336_v1 = vsel %vm96_vm1, %v326_v62, -inf }
 0x3e8   :  { %v331_v2 = vmax.f32 %v329_v61, %v330_v0  ;;  %v337_v3 = vrot.slane %v336_v1, 4 }
 0x3ea   :  { %v332_v4 = vrot.slane %v331_v2, 2  ;;  %v338_v5 = vmax.f32 %v336_v1, %v337_v3 }
 0x3ec   :  { %v333_v6 = vmax.f32 %v331_v2, %v332_v4  ;;  %v339_v7 = vrot.slane %v338_v5, 2 }
 0x3ee   :  { %v334_v8 = vrot.slane %v333_v6, 1  ;;  %v340_v9 = vmax.f32 %v338_v5, %v339_v7 }
 0x3f0   :  { %v341_v10 = vrot.slane %v340_v9, 1  ;;  %v335_v11 = vmax.f32 %v333_v6, %v334_v8 }
 0x3f2   :  { %v342_v12 = vmax.f32 %v340_v9, %v341_v10 }
 0x3f4   :  { %v346_v13 = vsel %vm345_vm3, %v342_v12, %v335_v11 }
 0x3f5   :  { %349 = vst.msk [vmem:[#allocation8] sm:$0x3] %vm348_vm4, %v346_v13 }
 0x3f6   :  { %511 = shalt.err (!%p508_p0)
}
 0x3f7   :  { %s512_s18 = scalar_lea.hbm %s668_s6, 32 }
 0x3f8   :  { %p513_p1 = scmp.ne.s32.totalorder %s668_s6, %s512_s18  ;;  %p516_p2 = scmp.lt.u32.totalorder %s512_s18, %s668_s6 }
 0x3fa   :  { %p518_p3 = pnand %p516_p2, %p513_p1 }
 0x3fc   :  { %521 = shalt.err (!%p518_p3)
}
 0x3fd   :  { %359 = dma.vmem_to_hbm [thread:$0]  %s357_s14, 32, %s668_s6, [#allocation4]  }
 0x3fe   :  { %526 = dma.done.wait [#allocation4], 32  }
 0x3ff   :  { %527 = vsyncadd [#allocation4], 4294967264 }
 0x400   :  { %363 = vsyncpa [#allocation3], 1 }
 0x401   :  { %364 = vsyncpa [#allocation6], 1 }
 0x402   :  { %365 = vsyncpa [#allocation4], 1 }

</bundles_post_ra>
